<compile_context>
chip_gen: v5e
topology: v5e:2x2
jax: 0.10.0
libtpu: 0.0.40
codegen_flags: <defaults>
</compile_context>

<pallas_src>
import functools

import jax
import jax.numpy as jnp
from jax.experimental import pallas as pl
from jax.experimental.pallas import tpu as pltpu


def _round_up(n, m):
    return ((n + m - 1) // m) * m


# ----------------------------------------------------------------------------
# Pallas kernel: fused (mean || scale) MADE chain + elementwise IAF combine.
# ----------------------------------------------------------------------------
def _iaf_fused_kernel(x_ref, w1_ref, b1_ref, w2_ref, b2_ref, w3_ref, b3_ref,
                      z_ref, m_ref, s_ref, *, input_dim):
    D = input_dim
    x = x_ref[...]                                          # [TB, D] f32

    # Three MXU matmuls (f32 operands, f32 accumulation).
    h1 = jnp.dot(x, w1_ref[...], preferred_element_type=jnp.float32) + b1_ref[...]
    h1 = jnp.maximum(h1, 0.0)
    h2 = jnp.dot(h1, w2_ref[...], preferred_element_type=jnp.float32) + b2_ref[...]
    h2 = jnp.maximum(h2, 0.0)
    o = jnp.dot(h2, w3_ref[...], preferred_element_type=jnp.float32) + b3_ref[...]

    m = o[:, :D]
    log_s = o[:, D:]
    s = jnp.maximum(jnp.exp(log_s), 1e-05)                  # torch.clamp(exp(.), min=1e-5)

    z_ref[...] = x * s + m
    m_ref[...] = m
    s_ref[...] = s


# ----------------------------------------------------------------------------
# MADE mask construction + deterministic parameter init (plain-JAX glue).
# ----------------------------------------------------------------------------
# TODO(synk): the MADE class itself was not provided with the spec; the degree
# assignment (cycle 1..D-1, sample=False) and the 0.1*normal init below are a
# deterministic stand-in and may differ from the original MADE's exact choices.
def _made_degrees(input_dim, hidden_dims, order):
    degrees = [jnp.asarray(order, dtype=jnp.int32)]          # input degrees = order
    for h in hidden_dims:
        deg = (jnp.arange(h, dtype=jnp.int32) % max(1, input_dim - 1)) + 1
        degrees.append(deg)
    return degrees


def _made_masks(input_dim, hidden_dims, order):
    """Masks per layer, each of shape [out_features, in_features]."""
    degrees = _made_degrees(input_dim, hidden_dims, order)
    masks = []
    for l in range(len(hidden_dims)):                        # hidden: out >= in
        masks.append((degrees[l + 1][:, None] >= degrees[l][None, :]).astype(jnp.float32))
    out_deg = jnp.asarray(order, dtype=jnp.int32)            # output: out > in (strict)
    masks.append((out_deg[:, None] > degrees[-1][None, :]).astype(jnp.float32))
    return masks


def _init_made_params(key, input_dim, hidden_dims):
    dims = [input_dim] + list(hidden_dims) + [input_dim]
    params = []
    for i in range(len(dims) - 1):
        key, kw, kb = jax.random.split(key, 3)
        w = 0.1 * jax.random.normal(kw, (dims[i + 1], dims[i]), jnp.float32)
        b = 0.1 * jax.random.normal(kb, (dims[i + 1],), jnp.float32)
        params.append((w, b))
    return params, key


def _masked_transposed(params, masks):
    """Apply mask and transpose each weight to [in, out]; bias -> [1, out]."""
    flat = []
    for (w, b), m in zip(params, masks):
        flat.append((w * m).T)            # [in, out]
        flat.append(b.reshape(1, -1))     # [1, out]
    return flat


def _fuse_made_pair(mean_flat, scale_flat, input_dim, hidden_dims):
    """Fuse the two MADEs into one concatenated / block-diagonal matmul chain.

    Hidden widths are zero-padded to a multiple of 128 lanes (free: they never
    touch HBM, padded units are exactly zero through ReLU and zero weights).
    """
    mw1, mb1, mw2, mb2, mw3, mb3 = mean_flat
    sw1, sb1, sw2, sb2, sw3, sb3 = scale_flat
    D = input_dim
    H1, H2 = hidden_dims
    H1p = _round_up(2 * H1, 128)
    H2p = _round_up(2 * H2, 128)

    w1 = jnp.zeros((D, H1p), jnp.float32)
    w1 = w1.at[:, :H1].set(mw1).at[:, H1:2 * H1].set(sw1)
    b1 = jnp.zeros((1, H1p), jnp.float32)
    b1 = b1.at[:, :H1].set(mb1).at[:, H1:2 * H1].set(sb1)

    w2 = jnp.zeros((H1p, H2p), jnp.float32)                  # block-diagonal
    w2 = w2.at[:H1, :H2].set(mw2).at[H1:2 * H1, H2:2 * H2].set(sw2)
    b2 = jnp.zeros((1, H2p), jnp.float32)
    b2 = b2.at[:, :H2].set(mb2).at[:, H2:2 * H2].set(sb2)

    w3 = jnp.zeros((H2p, 2 * D), jnp.float32)                # block-diagonal
    w3 = w3.at[:H2, :D].set(mw3).at[H2:2 * H2, D:].set(sw3)
    b3 = jnp.concatenate([mb3, sb3], axis=1)                 # [1, 2D]

    return w1, b1, w2, b2, w3, b3


class IAFBlockPallas:
    """JAX/Pallas equivalent of the PyTorch IAFBlock (forward only)."""

    # Max rows per batch tile.  Per-tile VMEM at 4096 rows (x + 3 outputs,
    # double-buffered, plus f32 hidden temporaries) is ~7 MiB -- comfortably
    # under the 32 MiB scoped default on every generation including v7x.
    MAX_TILE_B = 4096

    def __init__(self, input_dim, hidden_dims, reverse=True, seed=0):
        assert len(hidden_dims) == 2, "this kernel is specialized to 2 hidden layers"
        self.input_dim = input_dim
        self.hidden_dims = tuple(hidden_dims)
        if reverse:
            order = jnp.arange(input_dim, 0, -1, dtype=jnp.int32)
        else:
            order = jnp.arange(1, input_dim + 1, dtype=jnp.int32)
        self.order = order

        masks = _made_masks(input_dim, hidden_dims, order)
        key = jax.random.PRNGKey(seed)
        mean_params, key = _init_made_params(key, input_dim, hidden_dims)
        scale_params, key = _init_made_params(key, input_dim, hidden_dims)

        mean_flat = _masked_transposed(mean_params, masks)
        scale_flat = _masked_transposed(scale_params, masks)
        self.fused = _fuse_made_pair(mean_flat, scale_flat, input_dim, self.hidden_dims)

    @functools.partial(jax.jit, static_argnums=0)
    def __call__(self, x):
        x = x.astype(jnp.float32)
        B, D = x.shape
        assert D == self.input_dim
        w1, b1, w2, b2, w3, b3 = self.fused
        H1p = w1.shape[1]
        H2p = w2.shape[1]

        # Padding-aware tile choice: pick the number of tiles first, then size
        # each tile to cdiv(B, n_tiles) rounded up to the 8-row sublane quantum.
        n_tiles = max(1, pl.cdiv(B, self.MAX_TILE_B))
        if n_tiles == 1 and B > 1024:
            n_tiles = 2                      # let v7x split batch across its 2 TCs
        if n_tiles > 1 and (n_tiles % 2):
            n_tiles += 1                     # even grid -> balanced megacore split
        tile_b = max(8, _round_up(pl.cdiv(B, n_tiles), 8))
        b_pad = tile_b * n_tiles
        if b_pad != B:
            x = jnp.pad(x, ((0, b_pad - B), (0, 0)))
        grid = (n_tiles,)

        kernel = functools.partial(_iaf_fused_kernel, input_dim=D)
        out_sds = jax.ShapeDtypeStruct((b_pad, D), jnp.float32)
        row_spec = pl.BlockSpec((tile_b, D), lambda i: (i, 0))

        z, m, s = pl.pallas_call(
            kernel,
            out_shape=(out_sds, out_sds, out_sds),
            grid_spec=pltpu.PrefetchScalarGridSpec(
                num_scalar_prefetch=0,
                grid=grid,
                in_specs=[
                    pl.BlockSpec((tile_b, D), lambda i: (i, 0)),   # x (tiled)
                    pl.BlockSpec((D, H1p), lambda i: (0, 0)),      # w1 (resident)
                    pl.BlockSpec((1, H1p), lambda i: (0, 0)),      # b1
                    pl.BlockSpec((H1p, H2p), lambda i: (0, 0)),    # w2
                    pl.BlockSpec((1, H2p), lambda i: (0, 0)),      # b2
                    pl.BlockSpec((H2p, 2 * D), lambda i: (0, 0)),  # w3
                    pl.BlockSpec((1, 2 * D), lambda i: (0, 0)),    # b3
                ],
                out_specs=[row_spec, row_spec, row_spec],          # z, m, s
            ),
            compiler_params=pltpu.CompilerParams(
                dimension_semantics=("parallel",),
                vmem_limit_bytes=48 * 1024 * 1024,
            ),
        )(x, w1, b1, w2, b2, w3, b3)

        if b_pad != B:                      # leading-dim trim only (contiguous)
            z, m, s = z[:B], m[:B], s[:B]
        return z, m, s


# ----------------------------------------------------------------------------
# Pure-JAX reference (same fused f32 weights) for a correctness check.
# ----------------------------------------------------------------------------
def _reference_forward(block, x):
    x = x.astype(jnp.float32)
    D = block.input_dim
    w1, b1, w2, b2, w3, b3 = block.fused
    h1 = jnp.maximum(jnp.dot(x, w1, preferred_element_type=jnp.float32) + b1, 0.0)
    h2 = jnp.maximum(jnp.dot(h1, w2, preferred_element_type=jnp.float32) + b2, 0.0)
    o = jnp.dot(h2, w3, preferred_element_type=jnp.float32) + b3
    m = o[:, :D]
    s = jnp.maximum(jnp.exp(o[:, D:]), 1e-05)
    z = x * s + m
    return z, m, s


if __name__ == "__main__":
    input_dim = 16
    hidden_dims = (32, 32)

    block = IAFBlockPallas(input_dim, hidden_dims, reverse=True, seed=0)
    key = jax.random.PRNGKey(0)

    # Small batch (single tile).
    x_small = jax.random.normal(key, (8, input_dim), jnp.float32)
    z, m, s = block(x_small)
    jax.block_until_ready((z, m, s))
    z_r, m_r, s_r = _reference_forward(block, x_small)
    assert jnp.allclose(z, z_r, atol=2e-3, rtol=2e-3)
    assert jnp.allclose(m, m_r, atol=2e-3, rtol=2e-3)
    assert jnp.allclose(s, s_r, atol=2e-3, rtol=2e-3)

    # Batch not a multiple of 8, exercising padding-aware tiling.
    key2 = jax.random.PRNGKey(1)
    x_big = jax.random.normal(key2, (600, input_dim), jnp.float32)
    z2, m2, s2 = block(x_big)
    jax.block_until_ready((z2, m2, s2))
    z2_r, m2_r, s2_r = _reference_forward(block, x_big)
    assert jnp.allclose(z2, z2_r, atol=2e-3, rtol=2e-3)
    assert jnp.allclose(m2, m2_r, atol=2e-3, rtol=2e-3)
    assert jnp.allclose(s2, s2_r, atol=2e-3, rtol=2e-3)

    # TODO(synk): IAFBlock.inverse (sequential D-step autoregressive loop) is
    # not implemented as a kernel; only forward() is required here.
    print("KERNEL_OK")
</pallas_src>

<mosaic_0001>
module attributes {stable_mosaic.version = 11 : i64} {
  func.func @_iaf_fused_kernel(%arg0: i32, %arg1: memref<8x16xf32, #tpu.memory_space<vmem>>, %arg2: memref<16x128xf32, #tpu.memory_space<vmem>>, %arg3: memref<1x128xf32, #tpu.memory_space<vmem>>, %arg4: memref<128x128xf32, #tpu.memory_space<vmem>>, %arg5: memref<1x128xf32, #tpu.memory_space<vmem>>, %arg6: memref<128x32xf32, #tpu.memory_space<vmem>>, %arg7: memref<1x32xf32, #tpu.memory_space<vmem>>, %arg8: memref<8x16xf32, #tpu.memory_space<vmem>>, %arg9: memref<8x16xf32, #tpu.memory_space<vmem>>, %arg10: memref<8x16xf32, #tpu.memory_space<vmem>>) attributes {dimension_semantics = [#tpu.dimension_semantics<parallel>], iteration_bounds = array<i64: 1>, scalar_prefetch = 0 : i64, scratch_operands = 0 : i64, tpu.core_type = #tpu.core_type<tc>, window_params = [{transform_indices = @transform_0, window_bounds = array<i64: 8, 16>}, {pipeline_mode = #tpu.pipeline_mode<synchronous>, transform_indices = @transform_1, window_bounds = array<i64: 16, 128>}, {pipeline_mode = #tpu.pipeline_mode<synchronous>, transform_indices = @transform_2, window_bounds = array<i64: 1, 128>}, {pipeline_mode = #tpu.pipeline_mode<synchronous>, transform_indices = @transform_3, window_bounds = array<i64: 128, 128>}, {pipeline_mode = #tpu.pipeline_mode<synchronous>, transform_indices = @transform_4, window_bounds = array<i64: 1, 128>}, {pipeline_mode = #tpu.pipeline_mode<synchronous>, transform_indices = @transform_5, window_bounds = array<i64: 128, 32>}, {pipeline_mode = #tpu.pipeline_mode<synchronous>, transform_indices = @transform_6, window_bounds = array<i64: 1, 32>}, {transform_indices = @transform_7, window_bounds = array<i64: 8, 16>}, {transform_indices = @transform_8, window_bounds = array<i64: 8, 16>}, {transform_indices = @transform_9, window_bounds = array<i64: 8, 16>}]} {
    %c0 = arith.constant 0 : index
    %c0_0 = arith.constant 0 : index
    %0 = vector.load %arg1[%c0, %c0_0] : memref<8x16xf32, #tpu.memory_space<vmem>>, vector<8x16xf32>
    %c0_1 = arith.constant 0 : index
    %c0_2 = arith.constant 0 : index
    %1 = vector.load %arg2[%c0_1, %c0_2] : memref<16x128xf32, #tpu.memory_space<vmem>>, vector<16x128xf32>
    %cst = arith.constant dense<0.000000e+00> : vector<8x128xf32>
    %2 = tpu.matmul %0, %1, %cst {dimension_numbers = #tpu.dot_dimension_numbers<[1], [0], [0], [1], [0, 0, 1, 1], [], []>} : vector<8x16xf32>, vector<16x128xf32>, vector<8x128xf32> -> vector<8x128xf32>
    %c0_3 = arith.constant 0 : index
    %c0_4 = arith.constant 0 : index
    %3 = vector.load %arg3[%c0_3, %c0_4] : memref<1x128xf32, #tpu.memory_space<vmem>>, vector<1x128xf32>
    %4 = vector.broadcast %3 : vector<1x128xf32> to vector<8x128xf32>
    %5 = arith.addf %2, %4 : vector<8x128xf32>
    %cst_5 = arith.constant 0.000000e+00 : f32
    %6 = vector.broadcast %cst_5 : f32 to vector<8x128xf32>
    %7 = arith.maximumf %5, %6 : vector<8x128xf32>
    %c0_6 = arith.constant 0 : index
    %c0_7 = arith.constant 0 : index
    %8 = vector.load %arg4[%c0_6, %c0_7] : memref<128x128xf32, #tpu.memory_space<vmem>>, vector<128x128xf32>
    %cst_8 = arith.constant dense<0.000000e+00> : vector<8x128xf32>
    %9 = tpu.matmul %7, %8, %cst_8 {dimension_numbers = #tpu.dot_dimension_numbers<[1], [0], [0], [1], [0, 0, 1, 1], [], []>} : vector<8x128xf32>, vector<128x128xf32>, vector<8x128xf32> -> vector<8x128xf32>
    %c0_9 = arith.constant 0 : index
    %c0_10 = arith.constant 0 : index
    %10 = vector.load %arg5[%c0_9, %c0_10] : memref<1x128xf32, #tpu.memory_space<vmem>>, vector<1x128xf32>
    %11 = vector.broadcast %10 : vector<1x128xf32> to vector<8x128xf32>
    %12 = arith.addf %9, %11 : vector<8x128xf32>
    %cst_11 = arith.constant 0.000000e+00 : f32
    %13 = vector.broadcast %cst_11 : f32 to vector<8x128xf32>
    %14 = arith.maximumf %12, %13 : vector<8x128xf32>
    %c0_12 = arith.constant 0 : index
    %c0_13 = arith.constant 0 : index
    %15 = vector.load %arg6[%c0_12, %c0_13] : memref<128x32xf32, #tpu.memory_space<vmem>>, vector<128x32xf32>
    %cst_14 = arith.constant dense<0.000000e+00> : vector<8x32xf32>
    %16 = tpu.matmul %14, %15, %cst_14 {dimension_numbers = #tpu.dot_dimension_numbers<[1], [0], [0], [1], [0, 0, 1, 1], [], []>} : vector<8x128xf32>, vector<128x32xf32>, vector<8x32xf32> -> vector<8x32xf32>
    %c0_15 = arith.constant 0 : index
    %c0_16 = arith.constant 0 : index
    %17 = vector.load %arg7[%c0_15, %c0_16] : memref<1x32xf32, #tpu.memory_space<vmem>>, vector<1x32xf32>
    %18 = vector.broadcast %17 : vector<1x32xf32> to vector<8x32xf32>
    %19 = arith.addf %16, %18 : vector<8x32xf32>
    %20 = vector.extract_strided_slice %19 {offsets = [0, 0], sizes = [8, 16], strides = [1, 1]} : vector<8x32xf32> to vector<8x16xf32>
    %21 = vector.extract_strided_slice %19 {offsets = [0, 16], sizes = [8, 16], strides = [1, 1]} : vector<8x32xf32> to vector<8x16xf32>
    %22 = math.exp %21 : vector<8x16xf32>
    %cst_17 = arith.constant 9.99999974E-6 : f32
    %23 = vector.broadcast %cst_17 : f32 to vector<8x16xf32>
    %24 = arith.maximumf %22, %23 : vector<8x16xf32>
    %25 = arith.mulf %0, %24 : vector<8x16xf32>
    %26 = arith.addf %25, %20 : vector<8x16xf32>
    %c0_18 = arith.constant 0 : index
    %c0_19 = arith.constant 0 : index
    %27 = vector.load %arg8[%c0_18, %c0_19] : memref<8x16xf32, #tpu.memory_space<vmem>>, vector<8x16xf32>
    tpu.vector_store %arg8[%c0_18, %c0_19], %26 {strides = array<i32>} : memref<8x16xf32, #tpu.memory_space<vmem>>, vector<8x16xf32>,
    %c0_20 = arith.constant 0 : index
    %c0_21 = arith.constant 0 : index
    %28 = vector.load %arg9[%c0_20, %c0_21] : memref<8x16xf32, #tpu.memory_space<vmem>>, vector<8x16xf32>
    tpu.vector_store %arg9[%c0_20, %c0_21], %20 {strides = array<i32>} : memref<8x16xf32, #tpu.memory_space<vmem>>, vector<8x16xf32>,
    %c0_22 = arith.constant 0 : index
    %c0_23 = arith.constant 0 : index
    %29 = vector.load %arg10[%c0_22, %c0_23] : memref<8x16xf32, #tpu.memory_space<vmem>>, vector<8x16xf32>
    tpu.vector_store %arg10[%c0_22, %c0_23], %24 {strides = array<i32>} : memref<8x16xf32, #tpu.memory_space<vmem>>, vector<8x16xf32>,
    return
  }
  func.func @transform_0(%arg0: i32) -> (i32, i32) {
    %c0_i32 = arith.constant 0 : i32
    %c0_i32_0 = arith.constant 0 : i32
    return %arg0, %c0_i32 : i32, i32
  }
  func.func @transform_1(%arg0: i32) -> (i32, i32) {
    %c0_i32 = arith.constant 0 : i32
    %c0_i32_0 = arith.constant 0 : i32
    %c0_i32_1 = arith.constant 0 : i32
    return %c0_i32, %c0_i32_0 : i32, i32
  }
  func.func @transform_2(%arg0: i32) -> (i32, i32) {
    %c0_i32 = arith.constant 0 : i32
    %c0_i32_0 = arith.constant 0 : i32
    %c0_i32_1 = arith.constant 0 : i32
    return %c0_i32, %c0_i32_0 : i32, i32
  }
  func.func @transform_3(%arg0: i32) -> (i32, i32) {
    %c0_i32 = arith.constant 0 : i32
    %c0_i32_0 = arith.constant 0 : i32
    %c0_i32_1 = arith.constant 0 : i32
    return %c0_i32, %c0_i32_0 : i32, i32
  }
  func.func @transform_4(%arg0: i32) -> (i32, i32) {
    %c0_i32 = arith.constant 0 : i32
    %c0_i32_0 = arith.constant 0 : i32
    %c0_i32_1 = arith.constant 0 : i32
    return %c0_i32, %c0_i32_0 : i32, i32
  }
  func.func @transform_5(%arg0: i32) -> (i32, i32) {
    %c0_i32 = arith.constant 0 : i32
    %c0_i32_0 = arith.constant 0 : i32
    %c0_i32_1 = arith.constant 0 : i32
    return %c0_i32, %c0_i32_0 : i32, i32
  }
  func.func @transform_6(%arg0: i32) -> (i32, i32) {
    %c0_i32 = arith.constant 0 : i32
    %c0_i32_0 = arith.constant 0 : i32
    %c0_i32_1 = arith.constant 0 : i32
    return %c0_i32, %c0_i32_0 : i32, i32
  }
  func.func @transform_7(%arg0: i32) -> (i32, i32) {
    %c0_i32 = arith.constant 0 : i32
    %c0_i32_0 = arith.constant 0 : i32
    return %arg0, %c0_i32 : i32, i32
  }
  func.func @transform_8(%arg0: i32) -> (i32, i32) {
    %c0_i32 = arith.constant 0 : i32
    %c0_i32_0 = arith.constant 0 : i32
    return %arg0, %c0_i32 : i32, i32
  }
  func.func @transform_9(%arg0: i32) -> (i32, i32) {
    %c0_i32 = arith.constant 0 : i32
    %c0_i32_0 = arith.constant 0 : i32
    return %arg0, %c0_i32 : i32, i32
  }
}

</mosaic_0001>

<bundles_post_ra>
// kernel: a_call__.1
= control target key start
LH: loop header
LB: loop body
LE: loop exit
PB: predicated region body
PF: predicated region fallthrough
CT: control target
= control target key end

     0   :  { %15 = vsyncpa [#allocation3], 0  ;;  %s598_s0 = inlined_call_operand.hbm [shape: f32[8,16], index: 0, kind: input, shape index: {}]   ;;  %s599_s1 = inlined_call_operand.hbm [shape: f32[16,128], index: 1, kind: input, shape index: {}]   ;;  %s600_s2 = inlined_call_operand.hbm [shape: f32[1,128], index: 2, kind: input, shape index: {}]   ;;  %s601_s3 = inlined_call_operand.hbm [shape: f32[128,128], index: 3, kind: input, shape index: {}]   ;;  %s602_s4 = inlined_call_operand.vmem [shape: f32[1,128], index: 4, kind: input, shape index: {}]   ;;  %s603_s5 = inlined_call_operand.hbm [shape: f32[128,32], index: 5, kind: input, shape index: {}]   ;;  %s604_s6 = inlined_call_operand.vmem [shape: f32[1,32], index: 6, kind: input, shape index: {}]   ;;  %s605_s7 = inlined_call_operand.hbm [shape: f32[8,16], index: 7, kind: output, shape index: {0}]   ;;  %s606_s8 = inlined_call_operand.hbm [shape: f32[8,16], index: 8, kind: output, shape index: {1}]   ;;  %s607_s9 = inlined_call_operand.hbm [shape: f32[8,16], index: 9, kind: output, shape index: {2}]  }
   0x1   :  { %16 = vsyncpa [#allocation6], 0 }
   0x2   :  { %17 = vsyncpa [#allocation9], 0 }
   0x3   :  { %18 = vsyncpa [#allocation4], 0  ;;  %s35_s11 = sshll.u32 %s599_s1, 4  ;;  %s36_s11 = int_to_ptr.hbm [resolvable:$true] %s35_s11 }
   0x4   :  { %19 = vsyncpa [#allocation13], 0  ;;  %s499_s12 = smov [#allocation5]   ;;  %s59_s16 = sshll.u32 %s601_s3, 4  ;;  %s60_s16 = int_to_ptr.hbm [resolvable:$true] %s59_s16 }
   0x5   :  { %s37_s13 = sshll.u32 %s499_s12, 4  ;;  %s500_s17 = smov 128   ;;  %s38_s13 = int_to_ptr.vmem [resolvable:$true] %s37_s13 }
   0x6   :  { %s501_s18 = smov 8   ;;  %s502_s19 = smov [#allocation8]  }
   0x7   :  { %43 = dma.hbm_to_vmem [thread:$0]  %s36_s11, 256, %s38_s13, [#allocation6], %s500_s17, %s500_s17, %s501_s18  }
   0x8   :  { %s61_s20 = sshll.u32 %s502_s19, 4  ;;  %s25_s23 = sshll.u32 %s598_s0, 4  ;;  %s62_s20 = int_to_ptr.vmem [resolvable:$true] %s61_s20  ;;  %s26_s23 = int_to_ptr.hbm [resolvable:$true] %s25_s23 }
   0x9   :  { %67 = dma.hbm_to_vmem [thread:$0]  %s60_s16, 2048, %s62_s20, [#allocation9], %s500_s17, %s500_s17, %s501_s18  }
   0xa   :  { %s49_s25 = sshll.u32 %s600_s2, 4  ;;  %s503_s26 = smov [#allocation2]   ;;  %s50_s25 = int_to_ptr.hbm [resolvable:$true] %s49_s25 }
   0xb   :  { %s27_s27 = sshll.u32 %s503_s26, 4  ;;  %s504_s3 = smov [#allocation7]   ;;  %s28_s27 = int_to_ptr.vmem [resolvable:$true] %s27_s27 }
   0xc   :  { %30 = dma.hbm_to_vmem [thread:$0]  %s26_s23, 128, %s28_s27, [#allocation3]  }
   0xd   :  { %s51_s28 = sshll.u32 %s504_s3, 4  ;;  %s74_s10 = sshll.u32 %s603_s5, 4  ;;  %s52_s28 = int_to_ptr.vmem [resolvable:$true] %s51_s28  ;;  %s75_s10 = int_to_ptr.hbm [resolvable:$true] %s74_s10 }
   0xe   :  { %54 = dma.hbm_to_vmem [thread:$0]  %s50_s25, 16, %s52_s28, [#allocation6]  }
   0xf   :  { %s505_s0 = smov [#allocation10]  }
  0x10   :  { %s76_s11 = sshll.u32 %s505_s0, 4  ;;  %s77_s11 = int_to_ptr.vmem [resolvable:$true] %s76_s11 }
  0x11   :  { %82 = dma.hbm_to_vmem [thread:$0]  %s75_s10, 2048, %s77_s11, [#allocation9], %s500_s17, %s500_s17, %s501_s18  }
  0x12   :  { %489 = dma.done.wait [#allocation3], 128  }
  0x13   :  { %490 = vsyncadd [#allocation3], 4294967168 }
  0x14   :  { %491 = dma.done.wait [#allocation6], 272  }
  0x15   :  { %492 = vsyncadd [#allocation6], 4294967024 }
  0x16   :  { %493 = dma.done.wait [#allocation9], 4096  }
  0x17   :  { %494 = vsyncadd [#allocation9], 4294963200  ;;  %v107_v0 = vld [vmem:[#allocation5 + $0x8] sm:$0xff]  ;;  %v106_v1 = vld [vmem:[#allocation5] sm:$0xff]  ;;  %vm112_vm0 = vcmask 130048   ;;  %s506_s14 = smov [#allocation12]  }
  0x18   :  { %130 = vmatpush.msra.mxu0 %v107_v0  ;;  %v575_v2 = vld [vmem:[#allocation2] sm:$0xff]  ;;  %v152_v3 = vld [vmem:[#allocation8 + $0x78] sm:$0xff]  ;;  %v151_v4 = vld [vmem:[#allocation8 + $0x70] sm:$0xff]  ;;  %s246_s15 = sshll.u32 %s506_s14, 4  ;;  %s248_s18 = sshll.u32 %s606_s8, 4  ;;  %s247_s15 = int_to_ptr.vmem [resolvable:$true] %s246_s15  ;;  %s249_s18 = int_to_ptr.hbm [resolvable:$true] %s248_s18 }
  0x19   :  { %157 = vmatpush.msra.mxu1 %v152_v3  ;;  %v150_v5 = vld [vmem:[#allocation8 + $0x68] sm:$0xff]  ;;  %v149_v6 = vld [vmem:[#allocation8 + $0x60] sm:$0xff]  ;;  %v148_v7 = vld [vmem:[#allocation8 + $0x58] sm:$0xff]  ;;  %s259_s22 = sshll.u32 %s607_s9, 4  ;;  %s509_s23 = smov [#allocation11]   ;;  %s260_s22 = int_to_ptr.hbm [resolvable:$true] %s259_s22 }
  0x1a   :  { %131 = vmatpush.msra.mxu0 %v106_v1  ;;  %v147_v8 = vld [vmem:[#allocation8 + $0x50] sm:$0xff]  ;;  %v146_v9 = vld [vmem:[#allocation8 + $0x48] sm:$0xff]  ;;  %v145_v10 = vld [vmem:[#allocation8 + $0x40] sm:$0xff]  ;;  %s235_s1 = sshll.u32 %s509_s23, 4  ;;  %s237_s25 = sshll.u32 %s605_s7, 4  ;;  %s236_s1 = int_to_ptr.vmem [resolvable:$true] %s235_s1  ;;  %s238_s25 = int_to_ptr.hbm [resolvable:$true] %s237_s25 }
  0x1b   :  { %280 = vmatmul.msk.f32.vlgmr.msra.gmra.mxu0 %vm112_vm0, %v575_v2  ;;  %158 = vmatpush.msra.mxu1 %v151_v4  ;;  %v144_v11 = vld [vmem:[#allocation8 + $0x38] sm:$0xff]  ;;  %v143_v12 = vld [vmem:[#allocation8 + $0x30] sm:$0xff]  ;;  %v142_v13 = vld [vmem:[#allocation8 + $0x28] sm:$0xff] }
  0x1c   :  { %v141_v14 = vld [vmem:[#allocation8 + $0x20] sm:$0xff]  ;;  %v140_v15 = vld [vmem:[#allocation8 + $0x18] sm:$0xff]  ;;  %v139_v16 = vld [vmem:[#allocation8 + $0x10] sm:$0xff] }
  0x1d   :  { %159 = vmatpush.msra.mxu1 %v150_v5  ;;  %v138_v17 = vld [vmem:[#allocation8 + $0x8] sm:$0xff]  ;;  %v137_v18 = vld [vmem:[#allocation8] sm:$0xff]  ;;  %v193_v19 = vld [vmem:[#allocation10 + $0x78] sm:$0xff] }
  0x1e   :  { %v192_v20 = vld [vmem:[#allocation10 + $0x70] sm:$0xff]  ;;  %198 = vmatpush.msra.mxu2 %v193_v19  ;;  %v191_v21 = vld [vmem:[#allocation10 + $0x68] sm:$0xff]  ;;  %v190_v22 = vld [vmem:[#allocation10 + $0x60] sm:$0xff] }
  0x1f   :  { %160 = vmatpush.msra.mxu1 %v149_v6  ;;  %v189_v23 = vld [vmem:[#allocation10 + $0x58] sm:$0xff]  ;;  %v188_v24 = vld [vmem:[#allocation10 + $0x50] sm:$0xff]  ;;  %v187_v25 = vld [vmem:[#allocation10 + $0x48] sm:$0xff] }
  0x20   :  { %199 = vmatpush.msra.mxu2 %v192_v20  ;;  %v186_v26 = vld [vmem:[#allocation10 + $0x40] sm:$0xff]  ;;  %v185_v27 = vld [vmem:[#allocation10 + $0x38] sm:$0xff]  ;;  %v184_v28 = vld [vmem:[#allocation10 + $0x30] sm:$0xff] }
  0x21   :  { %161 = vmatpush.msra.mxu1 %v148_v7  ;;  %v183_v29 = vld [vmem:[#allocation10 + $0x28] sm:$0xff]  ;;  %v182_v30 = vld [vmem:[#allocation10 + $0x20] sm:$0xff]  ;;  %v181_v31 = vld [vmem:[#allocation10 + $0x18] sm:$0xff] }
  0x22   :  { %200 = vmatpush.msra.mxu2 %v191_v21  ;;  %v292_v32 = vld [vmem:[#allocation7] ss:$0 sm:$0xff]  ;;  %v180_v36 = vld [vmem:[#allocation10 + $0x10] sm:$0xff]  ;;  %v179_v37 = vld [vmem:[#allocation10 + $0x8] sm:$0xff] }
  0x23   :  { %162 = vmatpush.msra.mxu1 %v147_v8  ;;  %v178_v38 = vld [vmem:[#allocation10] sm:$0xff] }
  0x24   :  { %201 = vmatpush.msra.mxu2 %v190_v22  ;;  %v293_v39 = vld [vmem:[%s602_s4] ss:$0 sm:$0xff]  ;;  %s507_s4 = smov 112  }
  0x25   :  { %163 = vmatpush.msra.mxu1 %v146_v9  ;;  %v294_v43 = vld [vmem:[%s604_s6] ss:$0 sm:$0xff]  ;;  %s508_s6 = smov [#allocation14]  }
  0x26   :  { %202 = vmatpush.msra.mxu2 %v189_v23  ;;  %s257_s19 = sshll.u32 %s508_s6, 4  ;;  %s258_s19 = int_to_ptr.vmem [resolvable:$true] %s257_s19 }
  0x27   :  { %164 = vmatpush.msra.mxu1 %v145_v10 }
  0x28   :  { %203 = vmatpush.msra.mxu2 %v188_v24 }
  0x29   :  { %165 = vmatpush.msra.mxu1 %v144_v11 }
  0x2a   :  { %204 = vmatpush.msra.mxu2 %v187_v25 }
  0x2b   :  { %166 = vmatpush.msra.mxu1 %v143_v12 }
  0x2c   :  { %205 = vmatpush.msra.mxu2 %v186_v26 }
  0x2d   :  { %167 = vmatpush.msra.mxu1 %v142_v13 }
  0x2e   :  { %206 = vmatpush.msra.mxu2 %v185_v27 }
  0x2f   :  { %168 = vmatpush.msra.mxu1 %v141_v14 }
  0x30   :  { %207 = vmatpush.msra.mxu2 %v184_v28 }
  0x31   :  { %169 = vmatpush.msra.mxu1 %v140_v15 }
  0x32   :  { %208 = vmatpush.msra.mxu2 %v183_v29 }
  0x33   :  { %170 = vmatpush.msra.mxu1 %v139_v16 }
  0x34   :  { %209 = vmatpush.msra.mxu2 %v182_v30 }
  0x35   :  { %171 = vmatpush.msra.mxu1 %v138_v17 }
  0x36   :  { %210 = vmatpush.msra.mxu2 %v181_v31 }
  0x37   :  { %172 = vmatpush.msra.mxu1 %v137_v18 }
  0x38   :  { %211 = vmatpush.msra.mxu2 %v180_v36 }
  0x3a   :  { %212 = vmatpush.msra.mxu2 %v179_v37 }
  0x3c   :  { %213 = vmatpush.msra.mxu2 %v178_v38 }
  0x98   :  { %v133_v33 = vpop.f32.mrf.mxu0 }
  0x99   :  { %v134_v34 = vadd.f32 %v292_v32, %v133_v33 }
  0x9b   :  { %v136_v35 = vmax.f32 %v134_v34, 0.0 }
  0x9d   :  { %173 = vmatmul.f32.vlgmr.msra.gmra.mxu1 %v136_v35 }
 0x11a   :  { %v174_v40 = vpop.f32.mrf.mxu1 }
 0x11b   :  { %v175_v41 = vadd.f32 %v293_v39, %v174_v40 }
 0x11d   :  { %v177_v42 = vmax.f32 %v175_v41, 0.0 }
 0x11f   :  { %214 = vmatmul.f32.vlgmr.msra.gmra.mxu2 %v177_v42 }
 0x1a2   :  { %v215_v44 = vpop.f32.mrf.mxu2 }
 0x1a3   :  { %v216_v45 = vadd.f32 %v294_v43, %v215_v44 }
 0x1a5   :  { %228 = vst.msk [vmem:[#allocation12] sm:$0xff] %vm112_vm0, %v216_v45  ;;  %v218_v46 = vmul.f32 1.442695, %v216_v45 }
 0x1a6   :  { %251 = dma.vmem_to_hbm [thread:$0]  %s247_s15, 128, %s249_s18, [#allocation13]  }
 0x1a7   :  { %295 = vpow2.f32 %v218_v46 }
 0x1ad   :  { %v296_v47 = vpop.eup %295 }
 0x1ae   :  { %v220_v48 = vmax.f32 %v296_v47, 1e-05 }
 0x1b0   :  { %222 = vrot.lane.b32.xlu0 %v220_v48, %s507_s4 }
 0x222   :  { %v223_v49 = vpop.permute.xlu0 %222 }
 0x223   :  { %v225_v50 = vmul.f32 %v223_v49, %v575_v2  ;;  %229 = vst.msk [vmem:[#allocation14] sm:$0xff] %vm112_vm0, %v223_v49 }
 0x224   :  { %262 = dma.vmem_to_hbm [thread:$0]  %s258_s19, 128, %s260_s22, [#allocation13]  }
 0x225   :  { %v226_v51 = vadd.f32 %v225_v50, %v216_v45 }
 0x227   :  { %227 = vst.msk [vmem:[#allocation11] sm:$0xff] %vm112_vm0, %v226_v51 }
 0x228   :  { %240 = dma.vmem_to_hbm [thread:$0]  %s236_s1, 128, %s238_s25, [#allocation4]  }
 0x229   :  { %495 = dma.done.wait [#allocation4], 128  }
 0x22a   :  { %496 = vsyncadd [#allocation4], 4294967168 }
 0x22b   :  { %497 = dma.done.wait [#allocation13], 256  }
 0x22c   :  { %498 = vsyncadd [#allocation13], 4294967040 }
 0x22d   :  { %275 = vsyncpa [#allocation3], 1 }
 0x22e   :  { %276 = vsyncpa [#allocation6], 1 }
 0x22f   :  { %277 = vsyncpa [#allocation9], 1 }
 0x230   :  { %278 = vsyncpa [#allocation4], 1 }
 0x231   :  { %279 = vsyncpa [#allocation13], 1 }

</bundles_post_ra>
